<compile_context>
chip_gen: v7x
topology: tpu7x:2x2x1
jax: 0.10.0
libtpu: 0.0.40
codegen_flags: <defaults>
</compile_context>

<pallas_src>
import jax
import jax.numpy as jnp
import numpy as np
from jax.experimental import pallas as pl
from jax.experimental.pallas import tpu as pltpu


# ----------------------------------------------------------------------------
# Layout helpers
# ----------------------------------------------------------------------------
def _align8(n: int) -> int:
    return ((n + 7) // 8) * 8


def _align_lanes(n: int, lane: int = 128) -> int:
    return ((n + lane - 1) // lane) * lane


# ----------------------------------------------------------------------------
# Pallas kernel (static shapes / offsets baked in via closure)
# ----------------------------------------------------------------------------
def _make_kernel(cfg: dict, B: int):
    C, O, H, E, L = cfg["C"], cfg["O"], cfg["H"], cfg["E"], cfg["L"]
    GH, GW, OPAD = cfg["GH"], cfg["GW"], cfg["OPAD"]

    def kernel(idx_ref, dist_ref, h0_ref, p_ref, hout_ref, logit_ref):
        # ---- embeddings ------------------------------------------------------
        # One-hot built in-kernel from int32 indices (no (B,C) HBM round trip).
        idx = idx_ref[...]                                      # (B, 1) int32
        iota = jax.lax.broadcasted_iota(jnp.int32, (B, C), 1)   # (B, C)
        onehot = (iota == idx).astype(jnp.float32)

        w_in = p_ref[cfg["off_w_in"]:cfg["off_w_in"] + C, 0:E]      # (C, E)
        b_in = p_ref[cfg["off_b_in"]:cfg["off_b_in"] + 1, 0:E]      # (1, E)
        w_ctx = p_ref[cfg["off_w_ctx"]:cfg["off_w_ctx"] + 1, 0:E]   # (1, E)
        b_ctx = p_ref[cfg["off_b_ctx"]:cfg["off_b_ctx"] + 1, 0:E]   # (1, E)

        # id_embedding = relu(onehot @ W_in^T + b_in)
        id_emb = jnp.maximum(
            jnp.dot(onehot, w_in, preferred_element_type=jnp.float32) + b_in,
            0.0,
        )
        # latent_embedding = relu(distance @ W_ctx^T + b_ctx)  (K=1 -> bcast mul)
        lat_emb = jnp.maximum(dist_ref[...] * w_ctx + b_ctx, 0.0)

        x = id_emb * lat_emb  # (B, E) GRU input (single time step)

        # ---- stacked GRU cells (seq_len == 1, dropout inactive at eval) ------
        for l in range(L):
            in_l = E if l == 0 else H
            gw = cfg["off_gw"][l]
            gb = cfg["off_gb"][l]
            # Block-diagonal packed weight: rows [0:in_l] hold w_ih^T in lanes
            # [0:3H]; rows [in_l:in_l+H] hold w_hh^T in lanes [GH:GH+3H].
            w_bd = p_ref[gw:gw + in_l + H, 0:GW]     # (in_l+H, GW)
            b_bd = p_ref[gb:gb + 1, 0:GW]            # (1, GW)  [b_ih | pad | b_hh]
            h_prev = h0_ref[l]                       # (B, H)

            xh = jnp.concatenate([x, h_prev], axis=-1)          # (B, in_l+H)
            g = jnp.dot(xh, w_bd, preferred_element_type=jnp.float32) + b_bd

            # gi lanes [0:3H], gh lanes [GH:GH+3H]; gate order (r, z, n).
            r = jax.nn.sigmoid(g[:, 0:H] + g[:, GH:GH + H])
            z = jax.nn.sigmoid(g[:, H:2 * H] + g[:, GH + H:GH + 2 * H])
            n = jnp.tanh(g[:, 2 * H:3 * H] + r * g[:, GH + 2 * H:GH + 3 * H])
            h_new = (1.0 - z) * n + z * h_prev

            hout_ref[l] = h_new   # in-place (aliased with h0 at the HBM level)
            x = h_new             # input to next layer

        # ---- output head (lane-padded to OPAD -> full unmasked store) --------
        w_o = p_ref[cfg["off_w_h2o"]:cfg["off_w_h2o"] + H, 0:OPAD]   # (H, OPAD)
        b_o = p_ref[cfg["off_b_h2o"]:cfg["off_b_h2o"] + 1, 0:OPAD]   # (1, OPAD)
        logit_ref[...] = jnp.tanh(
            jnp.dot(x, w_o, preferred_element_type=jnp.float32) + b_o
        )

    return kernel


# ----------------------------------------------------------------------------
# Wrapper
# ----------------------------------------------------------------------------
def latent_hidden_gru_forward(batch_input, distance, hidden_state, params):
    """Runs the fused LatentHiddenGRU forward pass.

    batch_input: (B,) int32 item indices
    distance:    (B,) float32
    hidden_state:(L, B, H) float32
    Returns (logit (B, O), hidden (L, B, H), output (B, H)).
    """
    cfg = params["cfg"]
    L, H, O, C, E = cfg["L"], cfg["H"], cfg["O"], cfg["C"], cfg["E"]
    GW, OPAD = cfg["GW"], cfg["OPAD"]
    B = batch_input.shape[0]

    idx = batch_input.reshape(B, 1).astype(jnp.int32)
    dist = distance.reshape(B, 1).astype(jnp.float32)
    slab = params["param_slab"]

    # Advisory cost estimate (tiny kernel; keeps XLA from over-serializing).
    in_sizes = [E if l == 0 else H for l in range(L)]
    flops = int(2 * B * C * E + 3 * B * E
                + sum(2 * B * (il + H) * GW for il in in_sizes)
                + 2 * B * H * OPAD + 12 * L * B * H)
    transcendentals = int(3 * L * B * H + B * OPAD)
    bytes_accessed = int(slab.size * 4 + 2 * L * B * H * 4 + B * OPAD * 4 + B * 8)

    vmem = pl.BlockSpec(memory_space=pltpu.MemorySpace.VMEM)
    hidden_new, logit_pad = pl.pallas_call(
        _make_kernel(cfg, B),
        out_shape=(
            jax.ShapeDtypeStruct((L, B, H), jnp.float32),   # new hidden state
            jax.ShapeDtypeStruct((B, OPAD), jnp.float32),   # lane-padded logits
        ),
        in_specs=[vmem, vmem, vmem, vmem],
        out_specs=(vmem, vmem),
        input_output_aliases={2: 0},   # hidden_state (input 2) -> hidden out (output 0)
        cost_estimate=pl.CostEstimate(
            flops=flops,
            transcendentals=transcendentals,
            bytes_accessed=bytes_accessed,
        ),
    )(idx, dist, hidden_state, slab)

    logit = logit_pad[:, :O]
    # GRU `output` at seq_len == 1 is exactly the top layer's new hidden state.
    output = hidden_new[-1]
    return logit, hidden_new, output


# ----------------------------------------------------------------------------
# Pure-JAX reference (uses the raw, unpacked weights -> also validates packing)
# ----------------------------------------------------------------------------
def reference_forward(batch_input, distance, hidden_state, params):
    cfg, raw = params["cfg"], params["raw"]
    C, H, L = cfg["C"], cfg["H"], cfg["L"]

    onehot = jax.nn.one_hot(batch_input, C, dtype=jnp.float32)
    dist = distance.reshape(-1, 1).astype(jnp.float32)

    id_emb = jax.nn.relu(onehot @ raw["w_in"] + raw["b_in"])
    lat_emb = jax.nn.relu(dist @ raw["w_ctx"] + raw["b_ctx"])
    x = id_emb * lat_emb

    h_out = []
    for l in range(L):
        w_ih, w_hh = raw["w_ih"][l], raw["w_hh"][l]
        b_ih, b_hh = raw["b_ih"][l], raw["b_hh"][l]
        h_prev = hidden_state[l]
        gi = x @ w_ih + b_ih
        gh = h_prev @ w_hh + b_hh
        r = jax.nn.sigmoid(gi[:, 0:H] + gh[:, 0:H])
        z = jax.nn.sigmoid(gi[:, H:2 * H] + gh[:, H:2 * H])
        n = jnp.tanh(gi[:, 2 * H:] + r * gh[:, 2 * H:])
        h_new = (1.0 - z) * n + z * h_prev
        h_out.append(h_new)
        x = h_new

    logit = jnp.tanh(x @ raw["w_h2o"] + raw["b_h2o"])
    return logit, jnp.stack(h_out, axis=0), x


# ----------------------------------------------------------------------------
# Deterministic parameter construction (single packed, lane/sublane-aligned slab)
# ----------------------------------------------------------------------------
def make_params(key, input_size, output_size, hidden_size, num_layers,
                embedding_dim):
    assert input_size == output_size, "one-hot width must match input_layer"
    C, O, H, E, L = input_size, output_size, hidden_size, embedding_dim, num_layers
    s = 0.1

    ks = list(jax.random.split(key, 6 + 4 * L))

    def rnd(k, shape):
        return (s * jax.random.normal(k, shape)).astype(jnp.float32)

    # Raw (already-transposed) weights, PyTorch gate order (r, z, n).
    w_in = rnd(ks[0], (C, E));   b_in = rnd(ks[1], (E,))
    w_ctx = rnd(ks[2], (1, E));  b_ctx = rnd(ks[3], (E,))
    w_h2o = rnd(ks[4], (H, O));  b_h2o = rnd(ks[5], (O,))
    w_ih_l, w_hh_l, b_ih_l, b_hh_l = [], [], [], []
    for l in range(L):
        in_l = E if l == 0 else H
        kk = ks[6 + 4 * l: 6 + 4 * (l + 1)]
        w_ih_l.append(rnd(kk[0], (in_l, 3 * H)))
        w_hh_l.append(rnd(kk[1], (H, 3 * H)))
        b_ih_l.append(rnd(kk[2], (3 * H,)))
        b_hh_l.append(rnd(kk[3], (3 * H,)))

    # Lane layout: gh block starts at a 128-aligned lane; logits padded to 128.
    GH = _align_lanes(3 * H)          # lane offset of the w_hh block
    GW = GH + 3 * H                   # fused gate width
    OPAD = _align_lanes(O)            # lane-padded logit width
    PW = _align_lanes(max(E, GW, OPAD))

    # Sublane layout: every section starts at an 8-row boundary.
    r = 0
    off_w_in = r;  r += _align8(C)
    off_b_in = r;  r += 8
    off_w_ctx = r; r += 8
    off_b_ctx = r; r += 8
    off_gw, off_gb = [], []
    for l in range(L):
        in_l = E if l == 0 else H
        off_gw.append(r); r += _align8(in_l + H)
        off_gb.append(r); r += 8
    off_w_h2o = r; r += _align8(H)
    off_b_h2o = r; r += 8
    rows = r

    slab = jnp.zeros((rows, PW), jnp.float32)
    slab = slab.at[off_w_in:off_w_in + C, 0:E].set(w_in)
    slab = slab.at[off_b_in, 0:E].set(b_in)
    slab = slab.at[off_w_ctx, 0:E].set(w_ctx[0])
    slab = slab.at[off_b_ctx, 0:E].set(b_ctx)
    for l in range(L):
        in_l = E if l == 0 else H
        gw, gb = off_gw[l], off_gb[l]
        slab = slab.at[gw:gw + in_l, 0:3 * H].set(w_ih_l[l])                 # w_ih block
        slab = slab.at[gw + in_l:gw + in_l + H, GH:GH + 3 * H].set(w_hh_l[l])  # w_hh block
        slab = slab.at[gb, 0:3 * H].set(b_ih_l[l])
        slab = slab.at[gb, GH:GH + 3 * H].set(b_hh_l[l])
    slab = slab.at[off_w_h2o:off_w_h2o + H, 0:O].set(w_h2o)
    slab = slab.at[off_b_h2o, 0:O].set(b_h2o)

    cfg = dict(
        C=C, O=O, H=H, E=E, L=L, GH=GH, GW=GW, OPAD=OPAD, PW=PW, rows=rows,
        off_w_in=off_w_in, off_b_in=off_b_in, off_w_ctx=off_w_ctx,
        off_b_ctx=off_b_ctx, off_gw=tuple(off_gw), off_gb=tuple(off_gb),
        off_w_h2o=off_w_h2o, off_b_h2o=off_b_h2o,
    )
    raw = dict(w_in=w_in, b_in=b_in, w_ctx=w_ctx, b_ctx=b_ctx,
               w_ih=w_ih_l, w_hh=w_hh_l, b_ih=b_ih_l, b_hh=b_hh_l,
               w_h2o=w_h2o, b_h2o=b_h2o)

    return {"cfg": cfg, "raw": raw, "param_slab": slab}


# ----------------------------------------------------------------------------
if __name__ == "__main__":
    # Small shapes consistent with the module.
    B = 8                 # batch_size
    C = 32                # input_size == output_size (item vocabulary)
    E = 16                # embedding_dim
    H = 32                # hidden_size
    L = 2                 # num_layers

    key = jax.random.PRNGKey(0)
    kp, ki, kd, kh = jax.random.split(key, 4)

    params = make_params(kp, C, C, H, L, E)
    batch_input = jax.random.randint(ki, (B,), 0, C, dtype=jnp.int32)
    distance = jax.random.uniform(kd, (B,), dtype=jnp.float32)
    hidden_state = (0.1 * jax.random.normal(kh, (L, B, H))).astype(jnp.float32)

    # Compute the reference first (the kernel aliases/donates hidden_state's
    # buffer for the in-place hidden update).
    ref_logit, ref_hidden, ref_output = reference_forward(
        batch_input, distance, hidden_state, params)
    jax.block_until_ready((ref_logit, ref_hidden, ref_output))

    logit, hidden_new, output = latent_hidden_gru_forward(
        batch_input, distance, hidden_state, params)
    jax.block_until_ready((logit, hidden_new, output))

    np.testing.assert_allclose(np.asarray(logit), np.asarray(ref_logit),
                               rtol=1e-5, atol=1e-5)
    np.testing.assert_allclose(np.asarray(hidden_new), np.asarray(ref_hidden),
                               rtol=1e-5, atol=1e-5)
    np.testing.assert_allclose(np.asarray(output), np.asarray(ref_output),
                               rtol=1e-5, atol=1e-5)

    print("KERNEL_OK")
</pallas_src>

<mosaic_0001>
module attributes {stable_mosaic.version = 11 : i64} {
  func.func @kernel(%arg0: memref<8x1xi32, #tpu.memory_space<vmem>>, %arg1: memref<8x1xf32, #tpu.memory_space<vmem>>, %arg2: memref<2x8x32xf32, #tpu.memory_space<vmem>>, %arg3: memref<224x256xf32, #tpu.memory_space<vmem>>, %arg4: memref<2x8x32xf32, #tpu.memory_space<vmem>>, %arg5: memref<8x128xf32, #tpu.memory_space<vmem>>) attributes {dimension_semantics = [], scalar_prefetch = 0 : i64, scratch_operands = 0 : i64, tpu.core_type = #tpu.core_type<tc>} {
    %c0 = arith.constant 0 : index
    %c0_0 = arith.constant 0 : index
    %0 = vector.load %arg0[%c0, %c0_0] : memref<8x1xi32, #tpu.memory_space<vmem>>, vector<8x1xi32>
    %1 = tpu.iota {dimensions = array<i32: 1>} : vector<8x32xi32>
    %2 = vector.broadcast %0 : vector<8x1xi32> to vector<8x32xi32>
    %3 = arith.cmpi eq, %1, %2 : vector<8x32xi32>
    %4 = arith.extui %3 : vector<8x32xi1> to vector<8x32xi32>
    %5 = arith.sitofp %4 : vector<8x32xi32> to vector<8x32xf32>
    %c0_1 = arith.constant 0 : index
    %c0_2 = arith.constant 0 : index
    %6 = vector.load %arg3[%c0_1, %c0_2] : memref<224x256xf32, #tpu.memory_space<vmem>>, vector<32x16xf32>
    %c32 = arith.constant 32 : index
    %c0_3 = arith.constant 0 : index
    %7 = vector.load %arg3[%c32, %c0_3] : memref<224x256xf32, #tpu.memory_space<vmem>>, vector<1x16xf32>
    %c40 = arith.constant 40 : index
    %c0_4 = arith.constant 0 : index
    %8 = vector.load %arg3[%c40, %c0_4] : memref<224x256xf32, #tpu.memory_space<vmem>>, vector<1x16xf32>
    %c48 = arith.constant 48 : index
    %c0_5 = arith.constant 0 : index
    %9 = vector.load %arg3[%c48, %c0_5] : memref<224x256xf32, #tpu.memory_space<vmem>>, vector<1x16xf32>
    %cst = arith.constant dense<0.000000e+00> : vector<8x16xf32>
    %10 = tpu.matmul %5, %6, %cst {dimension_numbers = #tpu.dot_dimension_numbers<[1], [0], [0], [1], [0, 0, 1, 1], [], []>} : vector<8x32xf32>, vector<32x16xf32>, vector<8x16xf32> -> vector<8x16xf32>
    %11 = vector.broadcast %7 : vector<1x16xf32> to vector<8x16xf32>
    %12 = arith.addf %10, %11 : vector<8x16xf32>
    %cst_6 = arith.constant 0.000000e+00 : f32
    %13 = vector.broadcast %cst_6 : f32 to vector<8x16xf32>
    %14 = arith.maximumf %12, %13 : vector<8x16xf32>
    %c0_7 = arith.constant 0 : index
    %c0_8 = arith.constant 0 : index
    %15 = vector.load %arg1[%c0_7, %c0_8] : memref<8x1xf32, #tpu.memory_space<vmem>>, vector<8x1xf32>
    %16 = vector.broadcast %15 : vector<8x1xf32> to vector<8x16xf32>
    %17 = vector.broadcast %8 : vector<1x16xf32> to vector<8x16xf32>
    %18 = arith.mulf %16, %17 : vector<8x16xf32>
    %19 = vector.broadcast %9 : vector<1x16xf32> to vector<8x16xf32>
    %20 = arith.addf %18, %19 : vector<8x16xf32>
    %cst_9 = arith.constant 0.000000e+00 : f32
    %21 = vector.broadcast %cst_9 : f32 to vector<8x16xf32>
    %22 = arith.maximumf %20, %21 : vector<8x16xf32>
    %23 = arith.mulf %14, %22 : vector<8x16xf32>
    %c56 = arith.constant 56 : index
    %c0_10 = arith.constant 0 : index
    %24 = vector.load %arg3[%c56, %c0_10] : memref<224x256xf32, #tpu.memory_space<vmem>>, vector<48x224xf32>
    %c104 = arith.constant 104 : index
    %c0_11 = arith.constant 0 : index
    %25 = vector.load %arg3[%c104, %c0_11] : memref<224x256xf32, #tpu.memory_space<vmem>>, vector<1x224xf32>
    %c0_12 = arith.constant 0 : index
    %c0_13 = arith.constant 0 : index
    %c0_14 = arith.constant 0 : index
    %26 = vector.load %arg2[%c0_12, %c0_13, %c0_14] : memref<2x8x32xf32, #tpu.memory_space<vmem>>, vector<1x8x32xf32>
    %27 = vector.shape_cast %26 : vector<1x8x32xf32> to vector<8x32xf32>
    %28 = tpu.concatenate %23, %27 in 1 : vector<8x16xf32>, vector<8x32xf32> -> vector<8x48xf32>
    %cst_15 = arith.constant dense<0.000000e+00> : vector<8x224xf32>
    %29 = tpu.matmul %28, %24, %cst_15 {dimension_numbers = #tpu.dot_dimension_numbers<[1], [0], [0], [1], [0, 0, 1, 1], [], []>} : vector<8x48xf32>, vector<48x224xf32>, vector<8x224xf32> -> vector<8x224xf32>
    %30 = vector.broadcast %25 : vector<1x224xf32> to vector<8x224xf32>
    %31 = arith.addf %29, %30 : vector<8x224xf32>
    %32 = vector.extract_strided_slice %31 {offsets = [0, 0], sizes = [8, 32], strides = [1, 1]} : vector<8x224xf32> to vector<8x32xf32>
    %33 = vector.extract_strided_slice %31 {offsets = [0, 128], sizes = [8, 32], strides = [1, 1]} : vector<8x224xf32> to vector<8x32xf32>
    %34 = arith.addf %32, %33 : vector<8x32xf32>
    %35 = arith.negf %34 : vector<8x32xf32>
    %36 = math.exp %35 : vector<8x32xf32>
    %cst_16 = arith.constant 1.000000e+00 : f32
    %37 = vector.broadcast %cst_16 : f32 to vector<8x32xf32>
    %38 = arith.addf %37, %36 : vector<8x32xf32>
    %39 = arith.divf %37, %38 : vector<8x32xf32>
    %40 = vector.extract_strided_slice %31 {offsets = [0, 32], sizes = [8, 32], strides = [1, 1]} : vector<8x224xf32> to vector<8x32xf32>
    %41 = vector.extract_strided_slice %31 {offsets = [0, 160], sizes = [8, 32], strides = [1, 1]} : vector<8x224xf32> to vector<8x32xf32>
    %42 = arith.addf %40, %41 : vector<8x32xf32>
    %43 = arith.negf %42 : vector<8x32xf32>
    %44 = math.exp %43 : vector<8x32xf32>
    %cst_17 = arith.constant 1.000000e+00 : f32
    %45 = vector.broadcast %cst_17 : f32 to vector<8x32xf32>
    %46 = arith.addf %45, %44 : vector<8x32xf32>
    %47 = arith.divf %45, %46 : vector<8x32xf32>
    %48 = vector.extract_strided_slice %31 {offsets = [0, 64], sizes = [8, 32], strides = [1, 1]} : vector<8x224xf32> to vector<8x32xf32>
    %49 = vector.extract_strided_slice %31 {offsets = [0, 192], sizes = [8, 32], strides = [1, 1]} : vector<8x224xf32> to vector<8x32xf32>
    %50 = arith.mulf %39, %49 : vector<8x32xf32>
    %51 = arith.addf %48, %50 : vector<8x32xf32>
    %52 = math.tanh %51 : vector<8x32xf32>
    %cst_18 = arith.constant 1.000000e+00 : f32
    %53 = vector.broadcast %cst_18 : f32 to vector<8x32xf32>
    %54 = arith.subf %53, %47 : vector<8x32xf32>
    %55 = arith.mulf %54, %52 : vector<8x32xf32>
    %56 = arith.mulf %47, %27 : vector<8x32xf32>
    %57 = arith.addf %55, %56 : vector<8x32xf32>
    %c0_19 = arith.constant 0 : index
    %c0_20 = arith.constant 0 : index
    %c0_21 = arith.constant 0 : index
    %58 = vector.load %arg4[%c0_19, %c0_20, %c0_21] : memref<2x8x32xf32, #tpu.memory_space<vmem>>, vector<1x8x32xf32>
    %59 = vector.shape_cast %58 : vector<1x8x32xf32> to vector<8x32xf32>
    %60 = vector.shape_cast %57 : vector<8x32xf32> to vector<1x8x32xf32>
    tpu.vector_store %arg4[%c0_19, %c0_20, %c0_21], %60 {strides = array<i32>} : memref<2x8x32xf32, #tpu.memory_space<vmem>>, vector<1x8x32xf32>,
    %c112 = arith.constant 112 : index
    %c0_22 = arith.constant 0 : index
    %61 = vector.load %arg3[%c112, %c0_22] : memref<224x256xf32, #tpu.memory_space<vmem>>, vector<64x224xf32>
    %c176 = arith.constant 176 : index
    %c0_23 = arith.constant 0 : index
    %62 = vector.load %arg3[%c176, %c0_23] : memref<224x256xf32, #tpu.memory_space<vmem>>, vector<1x224xf32>
    %c1 = arith.constant 1 : index
    %c0_24 = arith.constant 0 : index
    %c0_25 = arith.constant 0 : index
    %63 = vector.load %arg2[%c1, %c0_24, %c0_25] : memref<2x8x32xf32, #tpu.memory_space<vmem>>, vector<1x8x32xf32>
    %64 = vector.shape_cast %63 : vector<1x8x32xf32> to vector<8x32xf32>
    %65 = tpu.concatenate %57, %64 in 1 : vector<8x32xf32>, vector<8x32xf32> -> vector<8x64xf32>
    %cst_26 = arith.constant dense<0.000000e+00> : vector<8x224xf32>
    %66 = tpu.matmul %65, %61, %cst_26 {dimension_numbers = #tpu.dot_dimension_numbers<[1], [0], [0], [1], [0, 0, 1, 1], [], []>} : vector<8x64xf32>, vector<64x224xf32>, vector<8x224xf32> -> vector<8x224xf32>
    %67 = vector.broadcast %62 : vector<1x224xf32> to vector<8x224xf32>
    %68 = arith.addf %66, %67 : vector<8x224xf32>
    %69 = vector.extract_strided_slice %68 {offsets = [0, 0], sizes = [8, 32], strides = [1, 1]} : vector<8x224xf32> to vector<8x32xf32>
    %70 = vector.extract_strided_slice %68 {offsets = [0, 128], sizes = [8, 32], strides = [1, 1]} : vector<8x224xf32> to vector<8x32xf32>
    %71 = arith.addf %69, %70 : vector<8x32xf32>
    %72 = arith.negf %71 : vector<8x32xf32>
    %73 = math.exp %72 : vector<8x32xf32>
    %cst_27 = arith.constant 1.000000e+00 : f32
    %74 = vector.broadcast %cst_27 : f32 to vector<8x32xf32>
    %75 = arith.addf %74, %73 : vector<8x32xf32>
    %76 = arith.divf %74, %75 : vector<8x32xf32>
    %77 = vector.extract_strided_slice %68 {offsets = [0, 32], sizes = [8, 32], strides = [1, 1]} : vector<8x224xf32> to vector<8x32xf32>
    %78 = vector.extract_strided_slice %68 {offsets = [0, 160], sizes = [8, 32], strides = [1, 1]} : vector<8x224xf32> to vector<8x32xf32>
    %79 = arith.addf %77, %78 : vector<8x32xf32>
    %80 = arith.negf %79 : vector<8x32xf32>
    %81 = math.exp %80 : vector<8x32xf32>
    %cst_28 = arith.constant 1.000000e+00 : f32
    %82 = vector.broadcast %cst_28 : f32 to vector<8x32xf32>
    %83 = arith.addf %82, %81 : vector<8x32xf32>
    %84 = arith.divf %82, %83 : vector<8x32xf32>
    %85 = vector.extract_strided_slice %68 {offsets = [0, 64], sizes = [8, 32], strides = [1, 1]} : vector<8x224xf32> to vector<8x32xf32>
    %86 = vector.extract_strided_slice %68 {offsets = [0, 192], sizes = [8, 32], strides = [1, 1]} : vector<8x224xf32> to vector<8x32xf32>
    %87 = arith.mulf %76, %86 : vector<8x32xf32>
    %88 = arith.addf %85, %87 : vector<8x32xf32>
    %89 = math.tanh %88 : vector<8x32xf32>
    %cst_29 = arith.constant 1.000000e+00 : f32
    %90 = vector.broadcast %cst_29 : f32 to vector<8x32xf32>
    %91 = arith.subf %90, %84 : vector<8x32xf32>
    %92 = arith.mulf %91, %89 : vector<8x32xf32>
    %93 = arith.mulf %84, %64 : vector<8x32xf32>
    %94 = arith.addf %92, %93 : vector<8x32xf32>
    %c1_30 = arith.constant 1 : index
    %c0_31 = arith.constant 0 : index
    %c0_32 = arith.constant 0 : index
    %95 = vector.load %arg4[%c1_30, %c0_31, %c0_32] : memref<2x8x32xf32, #tpu.memory_space<vmem>>, vector<1x8x32xf32>
    %96 = vector.shape_cast %95 : vector<1x8x32xf32> to vector<8x32xf32>
    %97 = vector.shape_cast %94 : vector<8x32xf32> to vector<1x8x32xf32>
    tpu.vector_store %arg4[%c1_30, %c0_31, %c0_32], %97 {strides = array<i32>} : memref<2x8x32xf32, #tpu.memory_space<vmem>>, vector<1x8x32xf32>,
    %c184 = arith.constant 184 : index
    %c0_33 = arith.constant 0 : index
    %98 = vector.load %arg3[%c184, %c0_33] : memref<224x256xf32, #tpu.memory_space<vmem>>, vector<32x128xf32>
    %c216 = arith.constant 216 : index
    %c0_34 = arith.constant 0 : index
    %99 = vector.load %arg3[%c216, %c0_34] : memref<224x256xf32, #tpu.memory_space<vmem>>, vector<1x128xf32>
    %cst_35 = arith.constant dense<0.000000e+00> : vector<8x128xf32>
    %100 = tpu.matmul %94, %98, %cst_35 {dimension_numbers = #tpu.dot_dimension_numbers<[1], [0], [0], [1], [0, 0, 1, 1], [], []>} : vector<8x32xf32>, vector<32x128xf32>, vector<8x128xf32> -> vector<8x128xf32>
    %101 = vector.broadcast %99 : vector<1x128xf32> to vector<8x128xf32>
    %102 = arith.addf %100, %101 : vector<8x128xf32>
    %103 = math.tanh %102 : vector<8x128xf32>
    %c0_36 = arith.constant 0 : index
    %c0_37 = arith.constant 0 : index
    %104 = vector.load %arg5[%c0_36, %c0_37] : memref<8x128xf32, #tpu.memory_space<vmem>>, vector<8x128xf32>
    tpu.vector_store %arg5[%c0_36, %c0_37], %103 {strides = array<i32>} : memref<8x128xf32, #tpu.memory_space<vmem>>, vector<8x128xf32>,
    return
  }
}

</mosaic_0001>

<bundles_post_ra>
// kernel: tpu_custom_call.1
= control target key start
LH: loop header
LB: loop body
LE: loop exit
PB: predicated region body
PF: predicated region fallthrough
CT: control target
= control target key end

     0   :  { %11 = vsyncpa [#allocation3], 0  ;;  %s895_s0 = inlined_call_operand.vmem [shape: s32[8,1], index: 0, kind: input, shape index: {}]   ;;  %s896_s1 = inlined_call_operand.vmem [shape: f32[8,1], index: 1, kind: input, shape index: {}]   ;;  %s897_s2 = inlined_call_operand.hbm [shape: f32[2,8,32], index: 2, kind: input, shape index: {}, may-alias: {2,4}]   ;;  %s898_s3 = inlined_call_operand.hbm [shape: f32[224,256], index: 3, kind: input, shape index: {}]   ;;  %s899_s4 = inlined_call_operand.hbm [shape: f32[2,8,32], index: 4, kind: output, shape index: {0}, may-alias: {2,4}]   ;;  %s900_s5 = inlined_call_operand.hbm [shape: f32[8,128], index: 5, kind: output, shape index: {1}]  }
   0x1   :  { %12 = vsyncpa [#allocation6], 0 }
   0x2   :  { %13 = vsyncpa [#allocation4], 0 }
   0x3   :  { %14 = vsyncpa [#allocation9], 0  ;;  %s750_s18 = smov [#allocation2]   ;;  %s654_s22 = scalar_lea.hbm %s897_s2, 256 }
   0x4   :  { %s24_s19 = sshll.u32 %s750_s18, 4  ;;  %p655_p0 = scmp.ne.s32.totalorder %s897_s2, %s654_s22  ;;  %s25_s19 = int_to_ptr.vmem [resolvable:$true] %s24_s19 }
   0x5   :  { %p658_p1 = scmp.lt.u32.totalorder %s654_s22, %s897_s2 }
   0x7   :  { %p660_p2 = pnand %p658_p1, %p655_p0 }
   0x9   :  { %663 = shalt.err (!%p660_p2)
}
   0xa   :  { %s664_s27 = scalar_lea.vmem %s25_s19, 256  ;;  %p669_p4 = scmp.lt.s32.totalorder %s25_s19, %s25_s19 }
   0xb   :  { %p665_p3 = scmp.ne.s32.totalorder %s25_s19, %s664_s27  ;;  %p670_p5 = scmp.lt.s32.totalorder %s664_s27, %s664_s27 }
   0xd   :  { %p671_p6 = por %p670_p5, %p669_p4 }
   0xf   :  { %p672_p7 = pnand %p671_p6, %p665_p3 }
  0x11   :  { %675 = shalt.err (!%p672_p7)
}
  0x12   :  { %s751_s28 = smov 128   ;;  %s752_s29 = smov 8  }
  0x13   :  { %30 = dma.hbm_to_vmem [thread:$0]  %s897_s2, 256, %s25_s19, [#allocation3], %s751_s28, %s751_s28, %s752_s29  }
  0x14   :  { %s753_s7 = smov [#allocation5]   ;;  %s676_s11 = scalar_lea.hbm %s898_s3, 7168 }
  0x15   :  { %s36_s8 = sshll.u32 %s753_s7, 4  ;;  %p677_p8 = scmp.ne.s32.totalorder %s898_s3, %s676_s11  ;;  %s37_s8 = int_to_ptr.vmem [resolvable:$true] %s36_s8 }
  0x16   :  { %p680_p9 = scmp.lt.u32.totalorder %s676_s11, %s898_s3 }
  0x18   :  { %p682_p10 = pnand %p680_p9, %p677_p8 }
  0x1a   :  { %685 = shalt.err (!%p682_p10)
}
  0x1b   :  { %s686_s16 = scalar_lea.vmem %s37_s8, 7168  ;;  %p691_p12 = scmp.lt.s32.totalorder %s37_s8, %s37_s8 }
  0x1c   :  { %p687_p11 = scmp.ne.s32.totalorder %s37_s8, %s686_s16  ;;  %p692_p13 = scmp.lt.s32.totalorder %s686_s16, %s686_s16 }
  0x1e   :  { %p693_p0 = por %p692_p13, %p691_p12 }
  0x20   :  { %p694_p1 = pnand %p693_p0, %p687_p11 }
  0x22   :  { %697 = shalt.err (!%p694_p1)
}
  0x23   :  { %s754_s2 = smov 256   ;;  %s755_s17 = smov 16  }
  0x24   :  { %42 = dma.hbm_to_vmem [thread:$0]  %s898_s3, 7168, %s37_s8, [#allocation6], %s754_s2, %s754_s2, %s755_s17  }
  0x25   :  { %742 = dma.done.wait [#allocation3], 256  }
  0x26   :  { %743 = vsyncadd [#allocation3], 4294967040 }
  0x27   :  { %744 = dma.done.wait [#allocation6], 7168  }
  0x28   :  { %745 = vsyncadd [#allocation6], 4294960128  ;;  %v756_v0 = vmov 0   ;;  %v757_v1 = vmov 0.0|0.0   ;;  %v758_v2 = vmov 0.0   ;;  %v49_v3 = vld [vmem:[%s895_s0] sm:$0xff]  ;;  %v50_v18 = vlaneseq }
  0x29   :  { %639 = vset.pattern.permute.xlu0 %v756_v0  ;;  %584 = vmatprep.subr.bf16.mxu0 %v757_v1  ;;  %v58_v4 = vld [vmem:[#allocation5] sm:$0xff]  ;;  %v59_v5 = vld [vmem:[#allocation5 + $0x10] sm:$0xff]  ;;  %vm759_vm0 = vmmov 0   ;;  %v151_v12 = vld [vmem:[#allocation5 + $0x78] sm:$0xff]  ;;  %vm65_vm1 = vcmask 261120   ;;  %vm169_vm3 = vcmask 130048  }
  0x2a   :  { %250 = vmatprep.mubr.f32.mxu1 %v758_v2  ;;  %53 = vperm.xlu0 %639, %v49_v3   ;;  %v60_v6 = vld [vmem:[#allocation5 + $0x20] sm:$0xff]  ;;  %v61_v7 = vld [vmem:[#allocation5 + $0x30] sm:$0xff]  ;;  %v585_v9 = vpack.c.bf16 %v59_v5, %v58_v4  ;;  %v153_v13 = vld [vmem:[#allocation5 + $0x88] sm:$0xff]  ;;  %v51_v19 = vand.u32 127, %v50_v18  ;;  %vm182_vm4 = vcmask 392192   ;;  %v842_v48 = vshrl.u32 %v50_v18, 7 }
  0x2b   :  { %v140_v8 = vld [vmem:[%s896_s1] sm:$0xff]  ;;  %570 = vmatprep.mubr.msk.f32.mxu0 %vm759_vm0, %v758_v2  ;;  %v588_v10 = vpack.c.bf16 %v61_v7, %v60_v6  ;;  %v590_v14 = vpack.c.bf16 %v153_v13, %v151_v12  ;;  %v152_v16 = vld [vmem:[#allocation5 + $0x80] sm:$0xff]  ;;  %v155_v22 = vld [vmem:[#allocation5 + $0x98] sm:$0xff]  ;;  %s760_s0 = smov 64   ;;  %s761_s1 = smov 32   ;;  %vm327_vm5 = vcmask 523264  }
  0x2c   :  { %586 = vmatpush3.bf16.msra.mxu0 %v585_v9  ;;  %v833_v11 = vld [vmem:[#allocation2] sm:$0xff]  ;;  %v157_v23 = vld [vmem:[#allocation5 + $0xa8] sm:$0xff]  ;;  %v156_v26 = vld [vmem:[#allocation5 + $0xa0] sm:$0xff]  ;;  %v178_v49 = vsub.s32 1, %v842_v48  ;;  %v174_v55 = vsub.s32 0, %v842_v48  ;;  %s762_s23 = smov 96  }
  0x2d   :  { %587 = vmatprep.subr.bf16.mxu0 %v757_v1  ;;  %166 = vrot.lane.b32.xlu1 %v833_v11, %s755_s17  ;;  %v150_v15 = vld [vmem:[#allocation5 + $0x70] sm:$0xff]  ;;  %v594_v24 = vpack.c.bf16 %v157_v23, %v155_v22  ;;  %v159_v28 = vld [vmem:[#allocation5 + $0xb8] sm:$0xff]  ;;  %v161_v29 = vld [vmem:[#allocation5 + $0xc8] sm:$0xff]  ;;  %s763_s24 = smov [#allocation7]  }
  0x2e   :  { %143 = vperm.xlu0 %639, %v140_v8   ;;  %v592_v17 = vpack.c.bf16 %v152_v16, %v150_v15  ;;  %591 = vmatprep.subr.bf16.mxu1 %v590_v14  ;;  %v154_v25 = vld [vmem:[#allocation5 + $0x90] sm:$0xff]  ;;  %v598_v30 = vpack.c.bf16 %v161_v29, %v159_v28  ;;  %v160_v32 = vld [vmem:[#allocation5 + $0xc0] sm:$0xff]  ;;  %v310_v4 = vld [vmem:[#allocation2 + $0x8] sm:$0xff]  ;;  %s518_s25 = sshll.u32 %s763_s24, 4  ;;  %s519_s25 = int_to_ptr.vmem [resolvable:$true] %s518_s25 }
  0x2f   :  { %v596_v27 = vpack.c.bf16 %v156_v26, %v154_v25  ;;  %v158_v31 = vld [vmem:[#allocation5 + $0xb0] sm:$0xff]  ;;  %v64_v37 = vld [vmem:[#allocation5 + $0x60] ss:$0 sm:$0xff]  ;;  %v292_v5 = vld [vmem:[#allocation5 + $0xe8] sm:$0xff]  ;;  %s698_s26 = scalar_lea.vmem %s519_s25, 256  ;;  %p703_p3 = scmp.lt.s32.totalorder %s519_s25, %s519_s25 }
  0x30   :  { %589 = vmatpush3.bf16.msra.mxu0 %v588_v10  ;;  %593 = vmatpush1.bf16.msra.mxu1 %v592_v17  ;;  %v600_v33 = vpack.c.bf16 %v160_v32, %v158_v31  ;;  %v63_v34 = vld [vmem:[#allocation5 + $0x50] ss:$0 sm:$0xff]  ;;  %v62_v38 = vld [vmem:[#allocation5 + $0x40] ss:$0 sm:$0xff]  ;;  %v294_v6 = vld [vmem:[#allocation5 + $0xf8] sm:$0xff]  ;;  %p699_p2 = scmp.ne.s32.totalorder %s519_s25, %s698_s26  ;;  %p704_p4 = scmp.lt.s32.totalorder %s698_s26, %s698_s26 }
  0x31   :  { %595 = vmatprep.subr.bf16.mxu1 %v594_v24  ;;  %v163_v50 = vld [vmem:[#allocation5 + $0xd0] ss:$8 sm:$0x3]  ;;  %v291_v7 = vld [vmem:[#allocation5 + $0xe0] sm:$0xff]  ;;  %v602_v8 = vpack.c.bf16 %v294_v6, %v292_v5  ;;  %v296_v10 = vld [vmem:[#allocation5 + $0x108] sm:$0xff] }
  0x32   :  { %v179_v51 = vrot.slane %v163_v50, %v178_v49  ;;  %v175_v56 = vrot.slane %v163_v50, %v174_v55  ;;  %v293_v9 = vld [vmem:[#allocation5 + $0xf0] sm:$0xff]  ;;  %v298_v12 = vld [vmem:[#allocation5 + $0x118] sm:$0xff]  ;;  %v295_v15 = vld [vmem:[#allocation5 + $0x100] sm:$0xff]  ;;  %p705_p5 = por %p704_p4, %p703_p3 }
  0x33   :  { %v604_v13 = vpack.c.bf16 %v293_v9, %v291_v7  ;;  %v606_v14 = vpack.c.bf16 %v298_v12, %v296_v10  ;;  %v297_v16 = vld [vmem:[#allocation5 + $0x110] sm:$0xff]  ;;  %v300_v17 = vld [vmem:[#allocation5 + $0x128] sm:$0xff]  ;;  %603 = vmatprep.subr.bf16.mxu0 %v602_v8  ;;  %v302_v18 = vld [vmem:[#allocation5 + $0x138] sm:$0xff] }
  0x34   :  { %597 = vmatpush1.bf16.msra.mxu1 %v596_v27  ;;  %v304_v22 = vld [vmem:[#allocation5 + $0x148] sm:$0xff]  ;;  %v306_v23 = vld [vmem:[#allocation5 + $0x158] sm:$0xff]  ;;  %v303_v27 = vld [vmem:[#allocation5 + $0x140] sm:$0xff]  ;;  %p706_p6 = pnand %p705_p5, %p699_p2 }
  0x35   :  { %599 = vmatprep.subr.bf16.mxu1 %v598_v30  ;;  %v614_v26 = vpack.c.bf16 %v306_v23, %v304_v22  ;;  %v305_v28 = vld [vmem:[#allocation5 + $0x150] sm:$0xff] }
  0x36   :  { %v616_v29 = vpack.c.bf16 %v305_v28, %v303_v27 }
  0x38   :  { %601 = vmatpush1.bf16.msra.mxu1 %v600_v33 }
  0x39   :  { %618 = vmatprep.subr.bf16.mxu1 %v757_v1 }
  0x9f   :  { %v167_v45 = vpop.permute.xlu1 %166 }
  0xa9   :  { %v54_v20 = vpop.permute.xlu0 %53 }
  0xaa   :  { %vm55_vm2 = vcmp.eq.s32.totalorder %v51_v19, %v54_v20  ;;  %v610_v19 = vpack.c.bf16 %v302_v18, %v300_v17  ;;  %v299_v20 = vld [vmem:[#allocation5 + $0x120] sm:$0xff] }
  0xab   :  { %v545_v21 = vsel %vm55_vm2, 1.0, %v758_v2 }
  0xac   :  { %571 = vmatmul.mubr.msk.f32.vlgmr.msra.gmra.mrb[0].mxu0 %vm65_vm1, %v545_v21  ;;  %v301_v21 = vld [vmem:[#allocation5 + $0x130] sm:$0xff] }
  0xad   :  { %395 = vmatprep.mubr.f32.mxu0 %v758_v2  ;;  %v144_v35 = vpop.permute.xlu0 %143  ;;  %605 = vmatpush1.bf16.msra.mxu0 %v604_v13  ;;  %v612_v25 = vpack.c.bf16 %v301_v21, %v299_v20 }
  0xae   :  { %v146_v36 = vmul.f32 %v144_v35, %v63_v34  ;;  %607 = vmatprep.subr.bf16.mxu0 %v606_v14 }
  0xb0   :  { %v147_v39 = vadd.f32 %v146_v36, %v64_v37 }
  0xb2   :  { %v148_v43 = vmax.f32 %v147_v39, 0.0  ;;  %v308_v39 = vld [vmem:[#allocation5 + $0x160] ss:$8 sm:$0x3] }
 0x17f   :  { %v135_v40 = vpop.f32.mrb[0].mxu0 }
 0x180   :  { %v136_v41 = vadd.f32 %v135_v40, %v62_v38  ;;  %v572_v42 = vpop.f32.mrb[1].mxu0  ;;  %v324_v40 = vrot.slane %v308_v39, %v178_v49 }
 0x182   :  { %v139_v44 = vmax.f32 %v136_v41, 0.0 }
 0x184   :  { %v149_v46 = vmul.f32 %v148_v43, %v139_v44  ;;  %v320_v44 = vrot.slane %v308_v39, %v174_v55  ;;  %v437_v55 = vld [vmem:[#allocation5 + $0x1a0] sm:$0xff] }
 0x186   :  { %v170_v47 = vsel %vm169_vm3, %v149_v46, %v167_v45 }
 0x187   :  { %547 = vmatmul.mubr.msk.f32.vlgmr.msra.gmra.mrb[0].mxu1 %vm182_vm4, %v170_v47 }
 0x188   :  { %581 = vmatprep.mubr.msk.f32.mxu1 %vm759_vm0, %v758_v2 }
 0x25a   :  { %v252_v52 = vpop.f32.mrb[0].mxu1 }
 0x25b   :  { %v254_v53 = vpop.f32.mrb[1].mxu1  ;;  %v253_v57 = vadd.f32 %v252_v52, %v175_v56 }
 0x25c   :  { %v255_v54 = vadd.f32 %v254_v53, %v179_v51 }
 0x25e   :  { %265 = vrot.lane.b32.xlu1 %v255_v54, %s760_s0  ;;  %v257_v58 = vadd.f32 %v255_v54, %v253_v57 }
 0x260   :  { %v548_v59 = vmul.f32 -1.442695, %v257_v58  ;;  %v435_v58 = vld [vmem:[#allocation5 + $0x180] sm:$0xff] }
 0x262   :  { %640 = vpow2.f32 %v548_v59  ;;  %v436_v59 = vld [vmem:[#allocation5 + $0x190] sm:$0xff] }
 0x26c   :  { %v641_v60 = vpop.eup %640 }
 0x26d   :  { %v261_v61 = vadd.f32 1.0, %v641_v60  ;;  %v622_v60 = vpack.c.bf16 %v437_v55, %v436_v59 }
 0x26f   :  { %642 = vrcp.f32 %v261_v61 }
 0x279   :  { %v643_v62 = vpop.eup %642 }
 0x27a   :  { %v275_v31 = vsub.f32 1.0, %v643_v62 }
 0x2d0   :  { %v266_v63 = vpop.permute.xlu1 %265 }
 0x2d1   :  { %v268_v0 = vmul.f32 %v643_v62, %v266_v63 }
 0x2d3   :  { %270 = vrot.lane.b32.xlu0 %v268_v0, %s760_s0 }
 0x2d7   :  { %281 = vrot.lane.b32.xlu0 %v833_v11, %s761_s1  ;;  %v608_v11 = vpack.c.bf16 %v297_v16, %v295_v15 }
 0x2d9   :  { %609 = vmatpush1.bf16.msra.mxu0 %v608_v11 }
 0x2da   :  { %611 = vmatprep.subr.bf16.mxu0 %v610_v19 }
 0x2db   :  { %312 = vrot.lane.b32.xlu0 %v310_v4, %s761_s1 }
 0x2dd   :  { %613 = vmatpush1.bf16.msra.mxu0 %v612_v25 }
 0x2de   :  { %615 = vmatprep.subr.bf16.mxu0 %v614_v26 }
 0x2e1   :  { %617 = vmatpush1.bf16.msra.mxu0 %v616_v29 }
 0x345   :  { %v271_v2 = vpop.permute.xlu0 %270 }
 0x346   :  { %v273_v3 = vadd.f32 %v271_v2, %v253_v57  ;;  %v434_v57 = vld [vmem:[#allocation5 + $0x170] sm:$0xff] }
 0x347   :  { %v619_v48 = vpack.c.bf16 %v435_v58, %v434_v57 }
 0x348   :  { %644 = vtanh.f32 %v273_v3 }
 0x349   :  { %v282_v30 = vpop.permute.xlu0 %281  ;;  %620 = vmatpush3.bf16.msra.mxu1 %v619_v48 }
 0x34a   :  { %v284_v33 = vmul.f32 %v643_v62, %v282_v30  ;;  %621 = vmatprep.subr.bf16.mxu1 %v757_v1 }
 0x34d   :  { %v313_v36 = vpop.permute.xlu0 %312  ;;  %623 = vmatpush3.bf16.msra.mxu1 %v622_v60 }
 0x352   :  { %v645_v24 = vpop.eup %644 }
 0x353   :  { %277 = vrot.lane.b32.xlu1 %v645_v24, %s762_s23 }
 0x3c5   :  { %v278_v32 = vpop.permute.xlu1 %277 }
 0x3c6   :  { %v280_v34 = vmul.f32 %v278_v32, %v275_v31 }
 0x3c8   :  { %v285_v35 = vadd.f32 %v284_v33, %v280_v34 }
 0x3ca   :  { %287 = vrot.lane.b32.xlu1 %v285_v35, %s762_s23 }
 0x43c   :  { %v288_v37 = vpop.permute.xlu1 %287 }
 0x43d   :  { %290 = vst.msk [vmem:[#allocation7] sm:$0xff] %vm65_vm1, %v288_v37  ;;  %v315_v38 = vsel %vm65_vm1, %v288_v37, %v313_v36 }
 0x43e   :  { %549 = vmatmul.mubr.msk.f32.vlgmr.msra.gmra.mrb[2].mxu0 %vm327_vm5, %v315_v38 }
 0x511   :  { %v397_v41 = vpop.f32.mrb[2].mxu0 }
 0x512   :  { %v399_v42 = vpop.f32.mrb[3].mxu0  ;;  %v398_v45 = vadd.f32 %v397_v41, %v320_v44 }
 0x513   :  { %v400_v43 = vadd.f32 %v399_v42, %v324_v40 }
 0x515   :  { %410 = vrot.lane.b32.xlu1 %v400_v43, %s760_s0  ;;  %v402_v46 = vadd.f32 %v400_v43, %v398_v45 }
 0x517   :  { %v550_v47 = vmul.f32 -1.442695, %v402_v46 }
 0x519   :  { %646 = vpow2.f32 %v550_v47 }
 0x523   :  { %v647_v50 = vpop.eup %646 }
 0x524   :  { %v406_v51 = vadd.f32 1.0, %v647_v50 }
 0x526   :  { %648 = vrcp.f32 %v406_v51 }
 0x530   :  { %v649_v52 = vpop.eup %648 }
 0x531   :  { %v420_v62 = vsub.f32 1.0, %v649_v52  ;;  %v426_v0 = vmul.f32 %v649_v52, %v313_v36 }
 0x587   :  { %v411_v53 = vpop.permute.xlu1 %410 }
 0x588   :  { %v413_v54 = vmul.f32 %v649_v52, %v411_v53 }
 0x58a   :  { %415 = vrot.lane.b32.xlu0 %v413_v54, %s760_s0 }
 0x5fc   :  { %v416_v49 = vpop.permute.xlu0 %415 }
 0x5fd   :  { %v418_v56 = vadd.f32 %v416_v49, %v398_v45 }
 0x5ff   :  { %650 = vtanh.f32 %v418_v56 }
 0x609   :  { %v651_v61 = vpop.eup %650 }
 0x60a   :  { %422 = vrot.lane.b32.xlu1 %v651_v61, %s762_s23 }
 0x67c   :  { %v423_v63 = vpop.permute.xlu1 %422 }
 0x67d   :  { %v425_v2 = vmul.f32 %v423_v63, %v420_v62 }
 0x67f   :  { %v427_v3 = vadd.f32 %v426_v0, %v425_v2 }
 0x681   :  { %429 = vrot.lane.b32.xlu0 %v427_v3, %s762_s23 }
 0x6f3   :  { %v430_v4 = vpop.permute.xlu0 %429 }
 0x6f4   :  { %433 = vst.msk [vmem:[#allocation7 + $0x8] sm:$0xff] %vm65_vm1, %v430_v4  ;;  %582 = vmatmul.mubr.msk.f32.vlgmr.msra.gmra.mrb[2].mxu1 %vm65_vm1, %v430_v4 }
 0x6f5   :  { %709 = shalt.err (!%p706_p6)
}
 0x6f6   :  { %s710_s6 = scalar_lea.hbm %s899_s4, 256 }
 0x6f7   :  { %p711_p7 = scmp.ne.s32.totalorder %s899_s4, %s710_s6  ;;  %p714_p8 = scmp.lt.u32.totalorder %s710_s6, %s899_s4 }
 0x6f9   :  { %p716_p9 = pnand %p714_p8, %p711_p7 }
 0x6fb   :  { %719 = shalt.err (!%p716_p9)
}
 0x6fc   :  { %524 = dma.vmem_to_hbm [thread:$0]  %s519_s25, 256, %s899_s4, [#allocation4], %s751_s28, %s751_s28, %s752_s29   ;;  %v438_v1 = vld [vmem:[#allocation5 + $0x1b0] ss:$0 sm:$0xff] }
 0x6fd   :  { %s764_s13 = smov [#allocation8]  }
 0x6fe   :  { %s531_s14 = sshll.u32 %s764_s13, 4  ;;  %s532_s14 = int_to_ptr.vmem [resolvable:$true] %s531_s14 }
 0x6ff   :  { %s720_s15 = scalar_lea.vmem %s532_s14, 128  ;;  %p725_p11 = scmp.lt.s32.totalorder %s532_s14, %s532_s14 }
 0x700   :  { %p721_p10 = scmp.ne.s32.totalorder %s532_s14, %s720_s15  ;;  %p726_p12 = scmp.lt.s32.totalorder %s720_s15, %s720_s15 }
 0x702   :  { %p727_p13 = por %p726_p12, %p725_p11 }
 0x704   :  { %p728_p0 = pnand %p727_p13, %p721_p10 }
 0x7c7   :  { %v507_v5 = vpop.f32.mrb[2].mxu1 }
 0x7c8   :  { %v508_v6 = vadd.f32 %v507_v5, %v438_v1  ;;  %v583_v7 = vpop.f32.mrb[3].mxu1 }
 0x7ca   :  { %652 = vtanh.f32 %v508_v6 }
 0x7d4   :  { %v653_v8 = vpop.eup %652 }
 0x7d5   :  { %512 = vst [vmem:[#allocation8] sm:$0xff] %v653_v8 }
 0x7d6   :  { %731 = shalt.err (!%p728_p0)
}
 0x7d7   :  { %s732_s4 = scalar_lea.hbm %s900_s5, 128 }
 0x7d8   :  { %p733_p1 = scmp.ne.s32.totalorder %s900_s5, %s732_s4  ;;  %p736_p2 = scmp.lt.u32.totalorder %s732_s4, %s900_s5 }
 0x7da   :  { %p738_p3 = pnand %p736_p2, %p733_p1 }
 0x7dc   :  { %741 = shalt.err (!%p738_p3)
}
 0x7dd   :  { %534 = dma.vmem_to_hbm [thread:$0]  %s532_s14, 128, %s900_s5, [#allocation9]  }
 0x7de   :  { %746 = dma.done.wait [#allocation4], 256  }
 0x7df   :  { %747 = vsyncadd [#allocation4], 4294967040 }
 0x7e0   :  { %748 = dma.done.wait [#allocation9], 128  }
 0x7e1   :  { %749 = vsyncadd [#allocation9], 4294967168 }
 0x7e2   :  { %541 = vsyncpa [#allocation3], 1 }
 0x7e3   :  { %542 = vsyncpa [#allocation6], 1 }
 0x7e4   :  { %543 = vsyncpa [#allocation4], 1 }
 0x7e5   :  { %544 = vsyncpa [#allocation9], 1 }

</bundles_post_ra>
